<compile_context>
chip_gen: v7x
topology: tpu7x:2x2x1
jax: 0.10.0
libtpu: 0.0.40
codegen_flags: <defaults>
</compile_context>

<pallas_src>
import functools

import jax
import jax.numpy as jnp
from jax.experimental import pallas as pl
from jax.experimental.pallas import tpu as pltpu


def _round_up(x: int, m: int) -> int:
    return ((x + m - 1) // m) * m


def _policy_mlp_kernel(x_ref, w1_ref, b1_ref, w2_ref, b2_ref, o_ref):
    # Cast activations to bf16 right before the MXU; accumulate in f32.
    x = x_ref[...].astype(jnp.bfloat16)
    h = jnp.dot(x, w1_ref[...], preferred_element_type=jnp.float32)
    h = jnp.maximum(h + b1_ref[...], 0.0)            # f32 epilogue (v5e-safe)
    y = jnp.dot(h.astype(jnp.bfloat16), w2_ref[...],
                preferred_element_type=jnp.float32)
    o_ref[...] = jnp.maximum(y + b2_ref[...], 0.0).astype(o_ref.dtype)


def prepare_params(w1, b1, w2, b2):
    """One-time parameter prep (hoisted out of the per-step wrapper)."""
    H = w2.shape[1]
    return (w1.astype(jnp.bfloat16),
            b1.reshape(1, H).astype(jnp.float32),
            w2.astype(jnp.bfloat16),
            b2.reshape(1, H).astype(jnp.float32))


def _choose_batch_tiling(B: int, block_b: int, min_tiles: int):
    """Pick a batch tile TB (multiple of 8) so padded Bp = n_tiles*TB ~ B."""
    n_tiles = max(pl.cdiv(B, max(block_b, 8)), min_tiles)
    n_tiles = min(n_tiles, pl.cdiv(B, 8))       # never tiles smaller than 8 rows
    n_tiles = max(n_tiles, 1)
    TB = _round_up(pl.cdiv(B, n_tiles), 8)
    return TB, n_tiles * TB, n_tiles


def custom_network_forward(features, params, *, block_b: int = 1024,
                           min_tiles: int = 1, out_dtype=jnp.bfloat16):
    """Pallas implementation of CustomNetwork.forward (== forward_actor).

    `params` is the tuple returned by prepare_params(). The same kernel serves
    forward_critic if called with the value_net parameters.
    """
    w1, b1_2d, w2, b2_2d = params
    B, F = features.shape
    H = w2.shape[1]
    assert w1.shape == (F, H) and w2.shape == (H, H)

    # v7x benefits from >=2 grid steps so both TensorCores get batch work;
    # only force it when there is enough batch to split.
    if B >= 128:
        min_tiles = max(min_tiles, 2)
    TB, Bp, n_tiles = _choose_batch_tiling(B, block_b, min_tiles)

    x = features
    if Bp != B:
        # Batch-only pad (no K padding, no dtype churn). Padded rows compute
        # relu(relu(b1)@W2+b2) garbage and are sliced off below.
        x = jnp.pad(x, ((0, Bp - B), (0, 0)))

    flops = 2 * Bp * (F * H + H * H)
    bytes_accessed = ((F * H + H * H) * 2                     # bf16 weights
                      + 2 * H * 4                             # f32 biases
                      + Bp * F * x.dtype.itemsize             # x in
                      + Bp * H * jnp.dtype(out_dtype).itemsize)  # out

    out = pl.pallas_call(
        _policy_mlp_kernel,
        out_shape=jax.ShapeDtypeStruct((Bp, H), out_dtype),
        grid=(n_tiles,),
        in_specs=[
            pl.BlockSpec((TB, F), lambda i: (i, 0)),   # x: tiled over batch
            pl.BlockSpec((F, H), lambda i: (0, 0)),    # w1: resident
            pl.BlockSpec((1, H), lambda i: (0, 0)),    # b1: resident
            pl.BlockSpec((H, H), lambda i: (0, 0)),    # w2: resident
            pl.BlockSpec((1, H), lambda i: (0, 0)),    # b2: resident
        ],
        out_specs=pl.BlockSpec((TB, H), lambda i: (i, 0)),
        compiler_params=pltpu.CompilerParams(
            dimension_semantics=("parallel",),         # v7x: batch across 2 TCs
            vmem_limit_bytes=32 * 1024 * 1024,         # safe on v7x's 64 MiB VMEM
        ),
        cost_estimate=pl.CostEstimate(
            flops=flops, transcendentals=0, bytes_accessed=bytes_accessed),
    )(x, w1, b1_2d, w2, b2_2d)

    return out[:B] if Bp != B else out


def init_params(key, feature_dim, hidden_dim):
    """Deterministic parameter init (Kaiming-uniform-like, as in nn.Linear)."""
    k1, k2, k3, k4 = jax.random.split(key, 4)
    lim1 = 1.0 / jnp.sqrt(feature_dim)
    lim2 = 1.0 / jnp.sqrt(hidden_dim)
    # stored as [in, out] (transposed vs PyTorch's [out, in])
    w1 = jax.random.uniform(k1, (feature_dim, hidden_dim), jnp.float32, -lim1, lim1)
    b1 = jax.random.uniform(k2, (hidden_dim,), jnp.float32, -lim1, lim1)
    w2 = jax.random.uniform(k3, (hidden_dim, hidden_dim), jnp.float32, -lim2, lim2)
    b2 = jax.random.uniform(k4, (hidden_dim,), jnp.float32, -lim2, lim2)
    return w1, b1, w2, b2


def _ref_f32(features, w1, b1, w2, b2):
    return jnp.maximum(jnp.maximum(features @ w1 + b1, 0.0) @ w2 + b2, 0.0)


if __name__ == "__main__":
    key = jax.random.PRNGKey(0)
    feature_dim = 32
    hidden_dim = 256          # last_layer_dim_pi default
    batch = 8

    kx, kp, kx2 = jax.random.split(key, 3)
    features = jax.random.normal(kx, (batch, feature_dim), jnp.float32)
    w1, b1, w2, b2 = init_params(kp, feature_dim, hidden_dim)
    params = prepare_params(w1, b1, w2, b2)   # one-time weight prep

    fwd = jax.jit(functools.partial(custom_network_forward, block_b=1024))

    # Small batch (single grid step, no padding: TB=8).
    out = jax.block_until_ready(fwd(features, params))
    assert out.shape == (batch, hidden_dim)
    ref = _ref_f32(features, w1, b1, w2, b2)
    assert jnp.allclose(out.astype(jnp.float32), ref, atol=5e-2, rtol=5e-2)

    # Larger, non-tile-aligned batch: B=520 -> 2+ balanced tiles, Bp=528.
    big_batch = 520
    features_big = jax.random.normal(kx2, (big_batch, feature_dim), jnp.float32)
    out_big = custom_network_forward(features_big, params, block_b=256)
    out_big = jax.block_until_ready(out_big)
    assert out_big.shape == (big_batch, hidden_dim)
    ref_big = _ref_f32(features_big, w1, b1, w2, b2)
    assert jnp.allclose(out_big.astype(jnp.float32), ref_big, atol=5e-2, rtol=5e-2)

    print("KERNEL_OK")
</pallas_src>

<mosaic_0001>
module attributes {stable_mosaic.version = 11 : i64} {
  func.func @_policy_mlp_kernel(%arg0: i32, %arg1: memref<8x32xf32, #tpu.memory_space<vmem>>, %arg2: memref<32x256xbf16, #tpu.memory_space<vmem>>, %arg3: memref<1x256xf32, #tpu.memory_space<vmem>>, %arg4: memref<256x256xbf16, #tpu.memory_space<vmem>>, %arg5: memref<1x256xf32, #tpu.memory_space<vmem>>, %arg6: memref<8x256xbf16, #tpu.memory_space<vmem>>) attributes {dimension_semantics = [#tpu.dimension_semantics<parallel>], iteration_bounds = array<i64: 1>, scalar_prefetch = 0 : i64, scratch_operands = 0 : i64, tpu.core_type = #tpu.core_type<tc>, window_params = [{transform_indices = @transform_0, window_bounds = array<i64: 8, 32>}, {pipeline_mode = #tpu.pipeline_mode<synchronous>, transform_indices = @transform_1, window_bounds = array<i64: 32, 256>}, {pipeline_mode = #tpu.pipeline_mode<synchronous>, transform_indices = @transform_2, window_bounds = array<i64: 1, 256>}, {pipeline_mode = #tpu.pipeline_mode<synchronous>, transform_indices = @transform_3, window_bounds = array<i64: 256, 256>}, {pipeline_mode = #tpu.pipeline_mode<synchronous>, transform_indices = @transform_4, window_bounds = array<i64: 1, 256>}, {transform_indices = @transform_5, window_bounds = array<i64: 8, 256>}]} {
    %c0 = arith.constant 0 : index
    %c0_0 = arith.constant 0 : index
    %0 = vector.load %arg1[%c0, %c0_0] : memref<8x32xf32, #tpu.memory_space<vmem>>, vector<8x32xf32>
    %1 = arith.truncf %0 : vector<8x32xf32> to vector<8x32xbf16>
    %c0_1 = arith.constant 0 : index
    %c0_2 = arith.constant 0 : index
    %2 = vector.load %arg2[%c0_1, %c0_2] : memref<32x256xbf16, #tpu.memory_space<vmem>>, vector<32x256xbf16>
    %cst = arith.constant dense<0.000000e+00> : vector<8x256xf32>
    %3 = tpu.matmul %1, %2, %cst {dimension_numbers = #tpu.dot_dimension_numbers<[1], [0], [0], [1], [0, 0, 1, 1], [], []>} : vector<8x32xbf16>, vector<32x256xbf16>, vector<8x256xf32> -> vector<8x256xf32>
    %c0_3 = arith.constant 0 : index
    %c0_4 = arith.constant 0 : index
    %4 = vector.load %arg3[%c0_3, %c0_4] : memref<1x256xf32, #tpu.memory_space<vmem>>, vector<1x256xf32>
    %5 = vector.broadcast %4 : vector<1x256xf32> to vector<8x256xf32>
    %6 = arith.addf %3, %5 : vector<8x256xf32>
    %cst_5 = arith.constant 0.000000e+00 : f32
    %7 = vector.broadcast %cst_5 : f32 to vector<8x256xf32>
    %8 = arith.maximumf %6, %7 : vector<8x256xf32>
    %9 = arith.truncf %8 : vector<8x256xf32> to vector<8x256xbf16>
    %c0_6 = arith.constant 0 : index
    %c0_7 = arith.constant 0 : index
    %10 = vector.load %arg4[%c0_6, %c0_7] : memref<256x256xbf16, #tpu.memory_space<vmem>>, vector<256x256xbf16>
    %cst_8 = arith.constant dense<0.000000e+00> : vector<8x256xf32>
    %11 = tpu.matmul %9, %10, %cst_8 {dimension_numbers = #tpu.dot_dimension_numbers<[1], [0], [0], [1], [0, 0, 1, 1], [], []>} : vector<8x256xbf16>, vector<256x256xbf16>, vector<8x256xf32> -> vector<8x256xf32>
    %c0_9 = arith.constant 0 : index
    %c0_10 = arith.constant 0 : index
    %12 = vector.load %arg5[%c0_9, %c0_10] : memref<1x256xf32, #tpu.memory_space<vmem>>, vector<1x256xf32>
    %13 = vector.broadcast %12 : vector<1x256xf32> to vector<8x256xf32>
    %14 = arith.addf %11, %13 : vector<8x256xf32>
    %cst_11 = arith.constant 0.000000e+00 : f32
    %15 = vector.broadcast %cst_11 : f32 to vector<8x256xf32>
    %16 = arith.maximumf %14, %15 : vector<8x256xf32>
    %17 = arith.truncf %16 : vector<8x256xf32> to vector<8x256xbf16>
    %c0_12 = arith.constant 0 : index
    %c0_13 = arith.constant 0 : index
    %18 = vector.load %arg6[%c0_12, %c0_13] : memref<8x256xbf16, #tpu.memory_space<vmem>>, vector<8x256xbf16>
    tpu.vector_store %arg6[%c0_12, %c0_13], %17 {strides = array<i32>} : memref<8x256xbf16, #tpu.memory_space<vmem>>, vector<8x256xbf16>,
    return
  }
  func.func @transform_0(%arg0: i32) -> (i32, i32) {
    %c0_i32 = arith.constant 0 : i32
    %c0_i32_0 = arith.constant 0 : i32
    return %arg0, %c0_i32 : i32, i32
  }
  func.func @transform_1(%arg0: i32) -> (i32, i32) {
    %c0_i32 = arith.constant 0 : i32
    %c0_i32_0 = arith.constant 0 : i32
    %c0_i32_1 = arith.constant 0 : i32
    return %c0_i32, %c0_i32_0 : i32, i32
  }
  func.func @transform_2(%arg0: i32) -> (i32, i32) {
    %c0_i32 = arith.constant 0 : i32
    %c0_i32_0 = arith.constant 0 : i32
    %c0_i32_1 = arith.constant 0 : i32
    return %c0_i32, %c0_i32_0 : i32, i32
  }
  func.func @transform_3(%arg0: i32) -> (i32, i32) {
    %c0_i32 = arith.constant 0 : i32
    %c0_i32_0 = arith.constant 0 : i32
    %c0_i32_1 = arith.constant 0 : i32
    return %c0_i32, %c0_i32_0 : i32, i32
  }
  func.func @transform_4(%arg0: i32) -> (i32, i32) {
    %c0_i32 = arith.constant 0 : i32
    %c0_i32_0 = arith.constant 0 : i32
    %c0_i32_1 = arith.constant 0 : i32
    return %c0_i32, %c0_i32_0 : i32, i32
  }
  func.func @transform_5(%arg0: i32) -> (i32, i32) {
    %c0_i32 = arith.constant 0 : i32
    %c0_i32_0 = arith.constant 0 : i32
    return %arg0, %c0_i32 : i32, i32
  }
}

</mosaic_0001>

<bundles_post_ra>
// kernel: custom_network_forward.1
= control target key start
LH: loop header
LB: loop body
LE: loop exit
PB: predicated region body
PF: predicated region fallthrough
CT: control target
= control target key end

     0   :  { %10 = vsyncpa [#allocation3], 0  ;;  %s711_s0 = inlined_call_operand.hbm [shape: f32[8,32], index: 0, kind: input, shape index: {}]   ;;  %s712_s1 = inlined_call_operand.hbm [shape: bf16[32,256], index: 1, kind: input, shape index: {}]   ;;  %s713_s2 = inlined_call_operand.vmem [shape: f32[1,256], index: 2, kind: input, shape index: {}]   ;;  %s714_s3 = inlined_call_operand.hbm [shape: bf16[256,256], index: 3, kind: input, shape index: {}]   ;;  %s715_s4 = inlined_call_operand.vmem [shape: f32[1,256], index: 4, kind: input, shape index: {}]   ;;  %s716_s5 = inlined_call_operand.hbm [shape: bf16[8,256], index: 5, kind: output, shape index: {}]  }
   0x1   :  { %11 = vsyncpa [#allocation6], 0 }
   0x2   :  { %12 = vsyncpa [#allocation4], 0  ;;  %s614_s18 = smov [#allocation5]   ;;  %s520_s22 = scalar_lea.hbm %s712_s1, 512 }
   0x3   :  { %s28_s19 = sshll.u32 %s614_s18, 4  ;;  %p521_p0 = scmp.ne.s32.totalorder %s712_s1, %s520_s22  ;;  %s29_s19 = int_to_ptr.vmem [resolvable:$true] %s28_s19 }
   0x4   :  { %p524_p1 = scmp.lt.u32.totalorder %s520_s22, %s712_s1 }
   0x6   :  { %p526_p2 = pnand %p524_p1, %p521_p0 }
   0x8   :  { %529 = shalt.err (!%p526_p2)
}
   0x9   :  { %s530_s27 = scalar_lea.vmem %s29_s19, 512  ;;  %p535_p4 = scmp.lt.s32.totalorder %s29_s19, %s29_s19 }
   0xa   :  { %p531_p3 = scmp.ne.s32.totalorder %s29_s19, %s530_s27  ;;  %p536_p5 = scmp.lt.s32.totalorder %s530_s27, %s530_s27 }
   0xc   :  { %p537_p6 = por %p536_p5, %p535_p4 }
   0xe   :  { %p538_p7 = pnand %p537_p6, %p531_p3 }
  0x10   :  { %541 = shalt.err (!%p538_p7)
}
  0x11   :  { %s615_s28 = smov 128   ;;  %s616_s29 = smov 8  }
  0x12   :  { %34 = dma.hbm_to_vmem [thread:$0]  %s712_s1, 512, %s29_s19, [#allocation6], %s615_s28, %s615_s28, %s616_s29  }
  0x13   :  { %s617_s7 = smov [#allocation2]   ;;  %s618_s9 = smov [#allocation7]  }
  0x14   :  { %s19_s8 = sshll.u32 %s617_s7, 4  ;;  %s42_s10 = sshll.u32 %s618_s9, 4  ;;  %s20_s8 = int_to_ptr.vmem [resolvable:$true] %s19_s8  ;;  %s43_s10 = int_to_ptr.vmem [resolvable:$true] %s42_s10 }
  0x15   :  { %s542_s13 = scalar_lea.hbm %s711_s0, 128 }
  0x16   :  { %p543_p8 = scmp.ne.s32.totalorder %s711_s0, %s542_s13  ;;  %p546_p9 = scmp.lt.u32.totalorder %s542_s13, %s711_s0 }
  0x18   :  { %p548_p10 = pnand %p546_p9, %p543_p8 }
  0x1a   :  { %551 = shalt.err (!%p548_p10)
}
  0x1b   :  { %s552_s1 = scalar_lea.vmem %s20_s8, 128  ;;  %p557_p12 = scmp.lt.s32.totalorder %s20_s8, %s20_s8 }
  0x1c   :  { %p553_p11 = scmp.ne.s32.totalorder %s20_s8, %s552_s1  ;;  %p558_p13 = scmp.lt.s32.totalorder %s552_s1, %s552_s1 }
  0x1e   :  { %p559_p0 = por %p558_p13, %p557_p12 }
  0x20   :  { %p560_p1 = pnand %p559_p0, %p553_p11 }
  0x22   :  { %563 = shalt.err (!%p560_p1)
}
  0x23   :  { %22 = dma.hbm_to_vmem [thread:$0]  %s711_s0, 128, %s20_s8, [#allocation3]  }
  0x24   :  { %s564_s22 = scalar_lea.hbm %s714_s3, 4096 }
  0x25   :  { %p565_p2 = scmp.ne.s32.totalorder %s714_s3, %s564_s22  ;;  %p568_p3 = scmp.lt.u32.totalorder %s564_s22, %s714_s3 }
  0x27   :  { %p570_p4 = pnand %p568_p3, %p565_p2 }
  0x29   :  { %573 = shalt.err (!%p570_p4)
}
  0x2a   :  { %s574_s27 = scalar_lea.vmem %s43_s10, 4096  ;;  %p579_p6 = scmp.lt.s32.totalorder %s43_s10, %s43_s10 }
  0x2b   :  { %p575_p5 = scmp.ne.s32.totalorder %s43_s10, %s574_s27  ;;  %p580_p7 = scmp.lt.s32.totalorder %s574_s27, %s574_s27 }
  0x2d   :  { %p581_p8 = por %p580_p7, %p579_p6 }
  0x2f   :  { %p582_p9 = pnand %p581_p8, %p575_p5 }
  0x31   :  { %585 = shalt.err (!%p582_p9)
}
  0x32   :  { %48 = dma.hbm_to_vmem [thread:$0]  %s714_s3, 4096, %s43_s10, [#allocation6], %s615_s28, %s615_s28, %s616_s29  }
  0x33   :  { %608 = dma.done.wait [#allocation3], 128  }
  0x34   :  { %609 = vsyncadd [#allocation3], 4294967168 }
  0x35   :  { %610 = dma.done.wait [#allocation6], 4608  }
  0x36   :  { %611 = vsyncadd [#allocation6], 4294962688  ;;  %v619_v0 = vmov 0   ;;  %v466_v1 = vld [vmem:[#allocation5 + $0x4] ss:$8 sps:$4 sm:$0xff]   ;;  %v61_v5 = vld [vmem:[#allocation2] sm:$0xff]  ;;  %v69_v39 = vlaneseq }
  0x37   :  { %135 = vmatprep.mubr.bf16.mxu0 %v619_v0  ;;  %v468_v2 = vld [vmem:[#allocation5] ss:$8 sps:$4 sm:$0xff]   ;;  %103 = vmatprep.subr.bf16.mxu0 %v466_v1  ;;  %v469_v3 = vld [vmem:[#allocation5 + $0x14] ss:$8 sps:$4 sm:$0xff]   ;;  %v471_v4 = vld [vmem:[#allocation5 + $0x10] ss:$8 sps:$4 sm:$0xff]   ;;  %v62_v9 = vpack.c.bf16 %v61_v5, %v61_v5 }
  0x38   :  { %104 = vmatpush1.bf16.msra.mxu0 %v468_v2  ;;  %v472_v6 = vld [vmem:[#allocation7 + $0x4] ss:$8 sps:$4 sm:$0xff]   ;;  %v474_v7 = vld [vmem:[#allocation7] ss:$8 sps:$4 sm:$0xff]   ;;  %v475_v8 = vld [vmem:[#allocation7 + $0x14] ss:$8 sps:$4 sm:$0xff]  }
  0x39   :  { %105 = vmatprep.subr.bf16.mxu0 %v469_v3  ;;  %352 = vmatprep.subr.bf16.mxu1 %v472_v6  ;;  %v477_v10 = vld [vmem:[#allocation7 + $0x10] ss:$8 sps:$4 sm:$0xff]   ;;  %vm99_vm0 = vcmask 261120   ;;  %v478_v11 = vld [vmem:[#allocation7 + $0x24] ss:$8 sps:$4 sm:$0xff]   ;;  %v70_v40 = vshrl.u32 %v69_v39, 7 }
  0x3a   :  { %353 = vmatpush1.bf16.msra.mxu1 %v474_v7  ;;  %v480_v12 = vld [vmem:[#allocation7 + $0x20] ss:$8 sps:$4 sm:$0xff]   ;;  %v481_v13 = vld [vmem:[#allocation7 + $0x34] ss:$8 sps:$4 sm:$0xff]   ;;  %v483_v14 = vld [vmem:[#allocation7 + $0x30] ss:$8 sps:$4 sm:$0xff]  }
  0x3b   :  { %354 = vmatprep.subr.bf16.mxu1 %v475_v8  ;;  %v484_v15 = vld [vmem:[#allocation7 + $0x44] ss:$8 sps:$4 sm:$0xff]   ;;  %v486_v16 = vld [vmem:[#allocation7 + $0x40] ss:$8 sps:$4 sm:$0xff]   ;;  %v487_v17 = vld [vmem:[#allocation7 + $0x54] ss:$8 sps:$4 sm:$0xff]  }
  0x3c   :  { %106 = vmatpush1.bf16.msra.mxu0 %v471_v4  ;;  %v489_v18 = vld [vmem:[#allocation7 + $0x50] ss:$8 sps:$4 sm:$0xff]   ;;  %v490_v19 = vld [vmem:[#allocation7 + $0x64] ss:$8 sps:$4 sm:$0xff]   ;;  %v492_v20 = vld [vmem:[#allocation7 + $0x60] ss:$8 sps:$4 sm:$0xff]  }
  0x3d   :  { %v493_v21 = vld [vmem:[#allocation7 + $0x74] ss:$8 sps:$4 sm:$0xff]   ;;  %v495_v22 = vld [vmem:[#allocation7 + $0x70] ss:$8 sps:$4 sm:$0xff]   ;;  %v496_v23 = vld [vmem:[#allocation7 + $0x84] ss:$8 sps:$4 sm:$0xff]  }
  0x3e   :  { %355 = vmatpush1.bf16.msra.mxu1 %v477_v10  ;;  %v498_v24 = vld [vmem:[#allocation7 + $0x80] ss:$8 sps:$4 sm:$0xff]   ;;  %v499_v25 = vld [vmem:[#allocation7 + $0x94] ss:$8 sps:$4 sm:$0xff]   ;;  %v501_v26 = vld [vmem:[#allocation7 + $0x90] ss:$8 sps:$4 sm:$0xff]  }
  0x3f   :  { %424 = vmatmul.mubr.msk.bf16.vlgmr.msra.gmra.mrb[0].mxu0 %vm99_vm0, %v62_v9  ;;  %356 = vmatprep.subr.bf16.mxu1 %v478_v11  ;;  %v502_v27 = vld [vmem:[#allocation7 + $0xa4] ss:$8 sps:$4 sm:$0xff]   ;;  %v504_v28 = vld [vmem:[#allocation7 + $0xa0] ss:$8 sps:$4 sm:$0xff]   ;;  %v505_v29 = vld [vmem:[#allocation7 + $0xb4] ss:$8 sps:$4 sm:$0xff]  }
  0x40   :  { %v507_v30 = vld [vmem:[#allocation7 + $0xb0] ss:$8 sps:$4 sm:$0xff]   ;;  %v508_v31 = vld [vmem:[#allocation7 + $0xc4] ss:$8 sps:$4 sm:$0xff]   ;;  %v510_v32 = vld [vmem:[#allocation7 + $0xc0] ss:$8 sps:$4 sm:$0xff]  }
  0x41   :  { %v511_v33 = vld [vmem:[#allocation7 + $0xd4] ss:$8 sps:$4 sm:$0xff]   ;;  %v513_v34 = vld [vmem:[#allocation7 + $0xd0] ss:$8 sps:$4 sm:$0xff]   ;;  %v514_v35 = vld [vmem:[#allocation7 + $0xe4] ss:$8 sps:$4 sm:$0xff]  }
  0x42   :  { %357 = vmatpush1.bf16.msra.mxu1 %v480_v12  ;;  %v516_v36 = vld [vmem:[#allocation7 + $0xe0] ss:$8 sps:$4 sm:$0xff]   ;;  %v517_v37 = vld [vmem:[#allocation7 + $0xf4] ss:$8 sps:$4 sm:$0xff]   ;;  %v519_v38 = vld [vmem:[#allocation7 + $0xf0] ss:$8 sps:$4 sm:$0xff]  }
  0x43   :  { %358 = vmatprep.subr.bf16.mxu1 %v481_v13  ;;  %v71_v41 = vsub.s32 0, %v70_v40  ;;  %v67_v42 = vld [vmem:[%s713_s2] sm:$0x3]  ;;  %v75_v43 = vsub.s32 1, %v70_v40  ;;  %s620_s2 = smov [#allocation8]  }
  0x44   :  { %v180_v56 = vld [vmem:[%s715_s4] sm:$0x3]  ;;  %s410_s7 = sshll.u32 %s620_s2, 4  ;;  %s411_s7 = int_to_ptr.vmem [resolvable:$true] %s410_s7 }
  0x45   :  { %v72_v44 = vrot.slane %v67_v42, %v71_v41  ;;  %v76_v45 = vrot.slane %v67_v42, %v75_v43  ;;  %v185_v57 = vrot.slane %v180_v56, %v71_v41  ;;  %v189_v58 = vrot.slane %v180_v56, %v75_v43  ;;  %s586_s8 = scalar_lea.vmem %s411_s7, 128  ;;  %p591_p11 = scmp.lt.s32.totalorder %s411_s7, %s411_s7 }
  0x46   :  { %359 = vmatpush1.bf16.msra.mxu1 %v483_v14  ;;  %p587_p10 = scmp.ne.s32.totalorder %s411_s7, %s586_s8  ;;  %p592_p12 = scmp.lt.s32.totalorder %s586_s8, %s586_s8 }
  0x47   :  { %360 = vmatprep.subr.bf16.mxu1 %v484_v15 }
  0x48   :  { %p593_p13 = por %p592_p12, %p591_p11 }
  0x4a   :  { %361 = vmatpush1.bf16.msra.mxu1 %v486_v16  ;;  %p594_p0 = pnand %p593_p13, %p587_p10 }
  0x4b   :  { %362 = vmatprep.subr.bf16.mxu1 %v487_v17 }
  0x4e   :  { %363 = vmatpush1.bf16.msra.mxu1 %v489_v18 }
  0x4f   :  { %364 = vmatprep.subr.bf16.mxu1 %v490_v19 }
  0x52   :  { %365 = vmatpush1.bf16.msra.mxu1 %v492_v20 }
  0x53   :  { %366 = vmatprep.subr.bf16.mxu1 %v493_v21 }
  0x56   :  { %367 = vmatpush1.bf16.msra.mxu1 %v495_v22 }
  0x57   :  { %368 = vmatprep.subr.bf16.mxu1 %v496_v23 }
  0x5a   :  { %369 = vmatpush1.bf16.msra.mxu1 %v498_v24 }
  0x5b   :  { %370 = vmatprep.subr.bf16.mxu1 %v499_v25 }
  0x5e   :  { %371 = vmatpush1.bf16.msra.mxu1 %v501_v26 }
  0x5f   :  { %372 = vmatprep.subr.bf16.mxu1 %v502_v27 }
  0x62   :  { %373 = vmatpush1.bf16.msra.mxu1 %v504_v28 }
  0x63   :  { %374 = vmatprep.subr.bf16.mxu1 %v505_v29 }
  0x66   :  { %375 = vmatpush1.bf16.msra.mxu1 %v507_v30 }
  0x67   :  { %376 = vmatprep.subr.bf16.mxu1 %v508_v31 }
  0x6a   :  { %377 = vmatpush1.bf16.msra.mxu1 %v510_v32 }
  0x6b   :  { %378 = vmatprep.subr.bf16.mxu1 %v511_v33 }
  0x6e   :  { %379 = vmatpush1.bf16.msra.mxu1 %v513_v34 }
  0x6f   :  { %380 = vmatprep.subr.bf16.mxu1 %v514_v35 }
  0x72   :  { %381 = vmatpush1.bf16.msra.mxu1 %v516_v36 }
  0x73   :  { %382 = vmatprep.subr.bf16.mxu1 %v517_v37 }
  0x76   :  { %383 = vmatpush1.bf16.msra.mxu1 %v519_v38 }
 0x112   :  { %v137_v46 = vpop.f32.mrb[0].mxu0 }
 0x113   :  { %v138_v47 = vadd.f32 %v137_v46, %v72_v44  ;;  %v139_v48 = vpop.f32.mrb[1].mxu0 }
 0x114   :  { %v140_v49 = vadd.f32 %v139_v48, %v76_v45  ;;  %v141_v50 = vpop.f32.mrb[2].mxu0 }
 0x115   :  { %v144_v51 = vmax.f32 %v138_v47, 0.0  ;;  %v142_v52 = vpop.f32.mrb[3].mxu0 }
 0x116   :  { %v145_v53 = vmax.f32 %v140_v49, 0.0 }
 0x117   :  { %v146_v55 = vpack.c.bf16 %v144_v51, %v144_v51 }
 0x118   :  { %v147_v54 = vpack.c.bf16 %v145_v53, %v145_v53 }
 0x11a   :  { %384 = vmatprep.mubr.bf16.mxu1 %v147_v54 }
 0x11b   :  { %385 = vmatmul.mubr.bf16.vlgmr.msra.gmra.mrb[0].mxu1 %v146_v55 }
 0x1ee   :  { %v386_v59 = vpop.f32.mrb[0].mxu1 }
 0x1ef   :  { %v387_v60 = vadd.f32 %v386_v59, %v185_v57  ;;  %v388_v61 = vpop.f32.mrb[1].mxu1 }
 0x1f0   :  { %v389_v62 = vadd.f32 %v388_v61, %v189_v58  ;;  %v390_v63 = vpop.f32.mrb[2].mxu1 }
 0x1f1   :  { %v393_v0 = vmax.f32 %v387_v60, 0.0  ;;  %v391_v1 = vpop.f32.mrb[3].mxu1 }
 0x1f2   :  { %v394_v2 = vmax.f32 %v389_v62, 0.0 }
 0x1f4   :  { %v458_v3 = vpack.c.bf16 %v394_v2, %v393_v0 }
 0x1f6   :  { %403 = vst [vmem:[#allocation8] sm:$0xff] %v458_v3 }
 0x1f7   :  { %597 = shalt.err (!%p594_p0)
}
 0x1f8   :  { %s598_s10 = scalar_lea.hbm %s716_s5, 128 }
 0x1f9   :  { %p599_p1 = scmp.ne.s32.totalorder %s716_s5, %s598_s10  ;;  %p602_p2 = scmp.lt.u32.totalorder %s598_s10, %s716_s5 }
 0x1fb   :  { %p604_p3 = pnand %p602_p2, %p599_p1 }
 0x1fd   :  { %607 = shalt.err (!%p604_p3)
}
 0x1fe   :  { %413 = dma.vmem_to_hbm [thread:$0]  %s411_s7, 128, %s716_s5, [#allocation4]  }
 0x1ff   :  { %612 = dma.done.wait [#allocation4], 128  }
 0x200   :  { %613 = vsyncadd [#allocation4], 4294967168 }
 0x201   :  { %417 = vsyncpa [#allocation3], 1 }
 0x202   :  { %418 = vsyncpa [#allocation6], 1 }
 0x203   :  { %419 = vsyncpa [#allocation4], 1 }

</bundles_post_ra>
